<compile_context>
chip_gen: v5e
topology: v5e:2x2
jax: 0.10.0
libtpu: 0.0.40
codegen_flags: <defaults>
</compile_context>

<pallas_src>
import functools
import math

import jax
import jax.numpy as jnp
from jax.experimental import pallas as pl
from jax.experimental.pallas import tpu as pltpu


def _mha_kernel(x_ref, gamma_ref, beta_ref,
                wqkv_ref, bqkv_ref,
                wqi_ref, bqi_ref, wki_ref, bki_ref, wvi_ref, bvi_ref,
                wo_ref, bo_ref, out_ref, attn_ref, *, num_heads):
    B, L, E = x_ref.shape                      # B = batch_tile
    H = num_heads
    Dh = E // H
    mm_dtype = wqkv_ref.dtype                  # matmul operand dtype (f32 / bf16)

    # Rows = batch*seq: all row-wise ops (LayerNorm, projections) share one M dim.
    x = x_ref[...].astype(jnp.float32).reshape(B * L, E)

    # ---- LayerNorm over embed dim (eps = 1e-5, nn.LayerNorm default), f32 stats.
    mean = jnp.mean(x, axis=-1, keepdims=True)
    xc = x - mean
    var = jnp.mean(xc * xc, axis=-1, keepdims=True)
    ln = xc * jax.lax.rsqrt(var + 1e-5) * gamma_ref[...] + beta_ref[...]

    # ---- Fused Q/K/V branch projections + ReLU: one (B*L,E) @ (E,3E) matmul.
    qkv0 = jnp.dot(ln.astype(mm_dtype), wqkv_ref[...],
                   preferred_element_type=jnp.float32) + bqkv_ref[...]
    qkv0 = jnp.maximum(qkv0, 0.0)
    q0 = qkv0[:, :E]
    k0 = qkv0[:, E:2 * E]
    v0 = qkv0[:, 2 * E:]

    # ---- MHA in-projections: one full-width (E,E) matmul per stream.
    #      (1/sqrt(Dh) already folded into wqi/bqi host-side.)
    q = jnp.dot(q0.astype(mm_dtype), wqi_ref[...],
                preferred_element_type=jnp.float32) + bqi_ref[...]
    k = jnp.dot(k0.astype(mm_dtype), wki_ref[...],
                preferred_element_type=jnp.float32) + bki_ref[...]
    v = jnp.dot(v0.astype(mm_dtype), wvi_ref[...],
                preferred_element_type=jnp.float32) + bvi_ref[...]

    # ---- Per-head scaled-dot-product attention, batched over the B_tile dim.
    #      H is a static constant; head outputs are written into their output
    #      columns of a VMEM scratch so the out-proj is one fused matmul.
    for h in range(H):
        sl = slice(h * Dh, (h + 1) * Dh)
        qh = q[:, sl].reshape(B, L, Dh)
        kh = k[:, sl].reshape(B, L, Dh)
        vh = v[:, sl].reshape(B, L, Dh)
        # Contraction on the last dim of both operands -> no explicit kh.T.
        s = jnp.einsum('bqd,bkd->bqk', qh, kh,
                       preferred_element_type=jnp.float32)          # (B, L, L)
        s = s - jnp.max(s, axis=-1, keepdims=True)
        p = jnp.exp(s)
        p = p * pl.reciprocal(jnp.sum(p, axis=-1, keepdims=True), approx=True)
        oh = jnp.einsum('bqk,bkd->bqd', p, vh,
                        preferred_element_type=jnp.float32)          # (B, L, Dh)
        attn_ref[:, sl] = oh.reshape(B * L, Dh)

    # ---- Fused out-proj: one (B*L,E) @ (E,E) matmul + bias + residual.
    attn = attn_ref[...]
    out = jnp.dot(attn.astype(mm_dtype), wo_ref[...],
                  preferred_element_type=jnp.float32) + bo_ref[...] + x
    out_ref[...] = out.reshape(B, L, E).astype(out_ref.dtype)


def _fuse_params(params, matmul_dtype=jnp.float32):
    """Host-side fusion of module-shaped parameters into kernel-friendly form."""
    H, E, Dh = params["w_q_in"].shape
    scale = 1.0 / math.sqrt(Dh)

    def flat_in(w):   # (H, E, Dh) -> (E, H*Dh); cols h*Dh:(h+1)*Dh == w[h]
        return jnp.transpose(w, (1, 0, 2)).reshape(E, H * Dh)

    def flat_b(b):    # (H, 1, Dh) -> (1, H*Dh)
        return b.reshape(1, H * Dh)

    return dict(
        gamma=params["gamma"].astype(jnp.float32),
        beta=params["beta"].astype(jnp.float32),
        # [Q | K | V] branch projections fused to (E, 3E).
        w_qkv=jnp.concatenate(
            [params["w_q"], params["w_k"], params["w_v"]], axis=1
        ).astype(matmul_dtype),
        b_qkv=jnp.concatenate(
            [params["b_q"], params["b_k"], params["b_v"]], axis=1
        ).astype(jnp.float32),
        # MHA in-proj per stream, full width; scale folded into Q.
        w_q_in=(flat_in(params["w_q_in"]) * scale).astype(matmul_dtype),
        b_q_in=(flat_b(params["b_q_in"]) * scale).astype(jnp.float32),
        w_k_in=flat_in(params["w_k_in"]).astype(matmul_dtype),
        b_k_in=flat_b(params["b_k_in"]).astype(jnp.float32),
        w_v_in=flat_in(params["w_v_in"]).astype(matmul_dtype),
        b_v_in=flat_b(params["b_v_in"]).astype(jnp.float32),
        # Out-proj flattened so concat(head_outs) @ w_o == sum_h oh @ w_o[h].
        w_o=params["w_o"].reshape(H * Dh, E).astype(matmul_dtype),
        b_o=params["b_o"].astype(jnp.float32),
    )


def multi_head_attention(inputs, params, *, batch_tile=None,
                         matmul_dtype=jnp.float32):
    """inputs: (L, N, E) float32, seq-first like PyTorch. Returns (L, N, E)."""
    L, N, E = inputs.shape
    H = params["w_q_in"].shape[0]

    if batch_tile is None:
        # Fill the matmul M dim with several sequences per step, but keep >= 2
        # grid steps when possible so both v7x TensorCores are used.
        batch_tile = max(1, N // 2)
        while N % batch_tile != 0:
            batch_tile -= 1
    assert N % batch_tile == 0, "batch must be divisible by batch_tile"

    fused = _fuse_params(params, matmul_dtype)

    # Batch-major view so the attention batch dim leads each block.
    # TODO(synk): for long production L, tile keys with an online-softmax
    #             accumulator (flash-style) instead of the full (L, L) scores.
    x = jnp.transpose(inputs, (1, 0, 2))  # (N, L, E)

    def w2d(arr):  # whole (small) 2-D parameter, constant across grid steps
        return pl.BlockSpec(arr.shape, lambda b: (0, 0))

    in_specs = [
        pl.BlockSpec((batch_tile, L, E), lambda b: (b, 0, 0)),   # x tile
        w2d(fused["gamma"]), w2d(fused["beta"]),                 # LayerNorm
        w2d(fused["w_qkv"]), w2d(fused["b_qkv"]),                # fused Q/K/V proj
        w2d(fused["w_q_in"]), w2d(fused["b_q_in"]),              # MHA in-proj Q
        w2d(fused["w_k_in"]), w2d(fused["b_k_in"]),              # MHA in-proj K
        w2d(fused["w_v_in"]), w2d(fused["b_v_in"]),              # MHA in-proj V
        w2d(fused["w_o"]), w2d(fused["b_o"]),                    # MHA out-proj
    ]
    out_spec = pl.BlockSpec((batch_tile, L, E), lambda b: (b, 0, 0))

    out = pl.pallas_call(
        functools.partial(_mha_kernel, num_heads=H),
        out_shape=jax.ShapeDtypeStruct((N, L, E), jnp.float32),
        grid_spec=pltpu.PrefetchScalarGridSpec(
            num_scalar_prefetch=0,
            grid=(N // batch_tile,),
            in_specs=in_specs,
            out_specs=out_spec,
            scratch_shapes=[pltpu.VMEM((batch_tile * L, E), jnp.float32)],
        ),
        compiler_params=pltpu.CompilerParams(
            dimension_semantics=("parallel",)),
    )(x, fused["gamma"], fused["beta"],
      fused["w_qkv"], fused["b_qkv"],
      fused["w_q_in"], fused["b_q_in"],
      fused["w_k_in"], fused["b_k_in"],
      fused["w_v_in"], fused["b_v_in"],
      fused["w_o"], fused["b_o"])

    return jnp.transpose(out, (1, 0, 2))  # back to (L, N, E)


def init_params(key, num_heads, embed_dim):
    """Deterministic synthetic parameters matching the module's shapes."""
    Dh = embed_dim // num_heads
    ks = jax.random.split(key, 16)

    def w(k, shape):
        return jax.random.normal(k, shape, jnp.float32) * 0.05

    return dict(
        # nn.LayerNorm(embed_dim)
        gamma=jnp.ones((1, embed_dim), jnp.float32),
        beta=jnp.zeros((1, embed_dim), jnp.float32),
        # Q/K/V_proj: Linear(E, E) stored pre-transposed as (E, E) for x @ W
        w_q=w(ks[0], (embed_dim, embed_dim)), b_q=w(ks[1], (1, embed_dim)),
        w_k=w(ks[2], (embed_dim, embed_dim)), b_k=w(ks[3], (1, embed_dim)),
        w_v=w(ks[4], (embed_dim, embed_dim)), b_v=w(ks[5], (1, embed_dim)),
        # nn.MultiheadAttention in_proj (3E, E) split into per-head (H, E, Dh)
        w_q_in=w(ks[6], (num_heads, embed_dim, Dh)),
        b_q_in=w(ks[7], (num_heads, 1, Dh)),
        w_k_in=w(ks[8], (num_heads, embed_dim, Dh)),
        b_k_in=w(ks[9], (num_heads, 1, Dh)),
        w_v_in=w(ks[10], (num_heads, embed_dim, Dh)),
        b_v_in=w(ks[11], (num_heads, 1, Dh)),
        # out_proj: Linear(E, E), per-head rows (H, Dh, E) so concat == sum of head matmuls
        w_o=w(ks[12], (num_heads, Dh, embed_dim)),
        b_o=w(ks[13], (1, embed_dim)),
    )


if __name__ == "__main__":
    num_heads = 4
    embed_dim = 32
    seq_len = 8
    batch = 2

    key = jax.random.PRNGKey(0)
    k_in, k_par = jax.random.split(key)
    # PyTorch nn.MultiheadAttention default layout: (seq, batch, embed)
    inputs = jax.random.normal(k_in, (seq_len, batch, embed_dim), jnp.float32)
    params = init_params(k_par, num_heads, embed_dim)

    # Default matmul_dtype=float32 matches the PyTorch module numerics;
    # pass matmul_dtype=jnp.bfloat16 on v6e/v7x for 2x MXU throughput.
    out = multi_head_attention(inputs, params)
    out = jax.block_until_ready(out)
    assert out.shape == (seq_len, batch, embed_dim)
    print("KERNEL_OK")
</pallas_src>

<mosaic_0001>
module attributes {stable_mosaic.version = 11 : i64} {
  func.func @_mha_kernel(%arg0: i32, %arg1: memref<1x8x32xf32, #tpu.memory_space<vmem>>, %arg2: memref<1x32xf32, #tpu.memory_space<vmem>>, %arg3: memref<1x32xf32, #tpu.memory_space<vmem>>, %arg4: memref<32x96xf32, #tpu.memory_space<vmem>>, %arg5: memref<1x96xf32, #tpu.memory_space<vmem>>, %arg6: memref<32x32xf32, #tpu.memory_space<vmem>>, %arg7: memref<1x32xf32, #tpu.memory_space<vmem>>, %arg8: memref<32x32xf32, #tpu.memory_space<vmem>>, %arg9: memref<1x32xf32, #tpu.memory_space<vmem>>, %arg10: memref<32x32xf32, #tpu.memory_space<vmem>>, %arg11: memref<1x32xf32, #tpu.memory_space<vmem>>, %arg12: memref<32x32xf32, #tpu.memory_space<vmem>>, %arg13: memref<1x32xf32, #tpu.memory_space<vmem>>, %arg14: memref<1x8x32xf32, #tpu.memory_space<vmem>>, %arg15: memref<8x32xf32, #tpu.memory_space<vmem>>) attributes {dimension_semantics = [#tpu.dimension_semantics<parallel>], iteration_bounds = array<i64: 2>, scalar_prefetch = 0 : i64, scratch_operands = 1 : i64, tpu.core_type = #tpu.core_type<tc>, window_params = [{transform_indices = @transform_0, window_bounds = array<i64: 1, 8, 32>}, {pipeline_mode = #tpu.pipeline_mode<synchronous>, transform_indices = @transform_1, window_bounds = array<i64: 1, 32>}, {pipeline_mode = #tpu.pipeline_mode<synchronous>, transform_indices = @transform_2, window_bounds = array<i64: 1, 32>}, {pipeline_mode = #tpu.pipeline_mode<synchronous>, transform_indices = @transform_3, window_bounds = array<i64: 32, 96>}, {pipeline_mode = #tpu.pipeline_mode<synchronous>, transform_indices = @transform_4, window_bounds = array<i64: 1, 96>}, {pipeline_mode = #tpu.pipeline_mode<synchronous>, transform_indices = @transform_5, window_bounds = array<i64: 32, 32>}, {pipeline_mode = #tpu.pipeline_mode<synchronous>, transform_indices = @transform_6, window_bounds = array<i64: 1, 32>}, {pipeline_mode = #tpu.pipeline_mode<synchronous>, transform_indices = @transform_7, window_bounds = array<i64: 32, 32>}, {pipeline_mode = #tpu.pipeline_mode<synchronous>, transform_indices = @transform_8, window_bounds = array<i64: 1, 32>}, {pipeline_mode = #tpu.pipeline_mode<synchronous>, transform_indices = @transform_9, window_bounds = array<i64: 32, 32>}, {pipeline_mode = #tpu.pipeline_mode<synchronous>, transform_indices = @transform_10, window_bounds = array<i64: 1, 32>}, {pipeline_mode = #tpu.pipeline_mode<synchronous>, transform_indices = @transform_11, window_bounds = array<i64: 32, 32>}, {pipeline_mode = #tpu.pipeline_mode<synchronous>, transform_indices = @transform_12, window_bounds = array<i64: 1, 32>}, {transform_indices = @transform_13, window_bounds = array<i64: 1, 8, 32>}]} {
    %c0 = arith.constant 0 : index
    %c0_0 = arith.constant 0 : index
    %c0_1 = arith.constant 0 : index
    %0 = vector.load %arg1[%c0, %c0_0, %c0_1] : memref<1x8x32xf32, #tpu.memory_space<vmem>>, vector<1x8x32xf32>
    %1 = vector.shape_cast %0 : vector<1x8x32xf32> to vector<8x32xf32>
    %cst = arith.constant dense<0.000000e+00> : vector<8xf32>
    %2 = vector.multi_reduction <add>, %1, %cst [1] : vector<8x32xf32> to vector<8xf32>
    %3 = vector.shape_cast %2 : vector<8xf32> to vector<8x1xf32>
    %cst_2 = arith.constant 3.200000e+01 : f32
    %4 = vector.broadcast %cst_2 : f32 to vector<8x1xf32>
    %5 = arith.divf %3, %4 : vector<8x1xf32>
    %6 = vector.broadcast %5 : vector<8x1xf32> to vector<8x32xf32>
    %7 = arith.subf %1, %6 : vector<8x32xf32>
    %8 = arith.mulf %7, %7 : vector<8x32xf32>
    %cst_3 = arith.constant dense<0.000000e+00> : vector<8xf32>
    %9 = vector.multi_reduction <add>, %8, %cst_3 [1] : vector<8x32xf32> to vector<8xf32>
    %10 = vector.shape_cast %9 : vector<8xf32> to vector<8x1xf32>
    %cst_4 = arith.constant 3.200000e+01 : f32
    %11 = vector.broadcast %cst_4 : f32 to vector<8x1xf32>
    %12 = arith.divf %10, %11 : vector<8x1xf32>
    %cst_5 = arith.constant 9.99999974E-6 : f32
    %13 = vector.broadcast %cst_5 : f32 to vector<8x1xf32>
    %14 = arith.addf %12, %13 : vector<8x1xf32>
    %15 = math.rsqrt %14 : vector<8x1xf32>
    %16 = vector.broadcast %15 : vector<8x1xf32> to vector<8x32xf32>
    %17 = arith.mulf %7, %16 : vector<8x32xf32>
    %c0_6 = arith.constant 0 : index
    %c0_7 = arith.constant 0 : index
    %18 = vector.load %arg2[%c0_6, %c0_7] : memref<1x32xf32, #tpu.memory_space<vmem>>, vector<1x32xf32>
    %19 = vector.broadcast %18 : vector<1x32xf32> to vector<8x32xf32>
    %20 = arith.mulf %17, %19 : vector<8x32xf32>
    %c0_8 = arith.constant 0 : index
    %c0_9 = arith.constant 0 : index
    %21 = vector.load %arg3[%c0_8, %c0_9] : memref<1x32xf32, #tpu.memory_space<vmem>>, vector<1x32xf32>
    %22 = vector.broadcast %21 : vector<1x32xf32> to vector<8x32xf32>
    %23 = arith.addf %20, %22 : vector<8x32xf32>
    %c0_10 = arith.constant 0 : index
    %c0_11 = arith.constant 0 : index
    %24 = vector.load %arg4[%c0_10, %c0_11] : memref<32x96xf32, #tpu.memory_space<vmem>>, vector<32x96xf32>
    %cst_12 = arith.constant dense<0.000000e+00> : vector<8x96xf32>
    %25 = tpu.matmul %23, %24, %cst_12 {dimension_numbers = #tpu.dot_dimension_numbers<[1], [0], [0], [1], [0, 0, 1, 1], [], []>} : vector<8x32xf32>, vector<32x96xf32>, vector<8x96xf32> -> vector<8x96xf32>
    %c0_13 = arith.constant 0 : index
    %c0_14 = arith.constant 0 : index
    %26 = vector.load %arg5[%c0_13, %c0_14] : memref<1x96xf32, #tpu.memory_space<vmem>>, vector<1x96xf32>
    %27 = vector.broadcast %26 : vector<1x96xf32> to vector<8x96xf32>
    %28 = arith.addf %25, %27 : vector<8x96xf32>
    %cst_15 = arith.constant 0.000000e+00 : f32
    %29 = vector.broadcast %cst_15 : f32 to vector<8x96xf32>
    %30 = arith.maximumf %28, %29 : vector<8x96xf32>
    %31 = vector.extract_strided_slice %30 {offsets = [0, 0], sizes = [8, 32], strides = [1, 1]} : vector<8x96xf32> to vector<8x32xf32>
    %32 = vector.extract_strided_slice %30 {offsets = [0, 32], sizes = [8, 32], strides = [1, 1]} : vector<8x96xf32> to vector<8x32xf32>
    %33 = vector.extract_strided_slice %30 {offsets = [0, 64], sizes = [8, 32], strides = [1, 1]} : vector<8x96xf32> to vector<8x32xf32>
    %c0_16 = arith.constant 0 : index
    %c0_17 = arith.constant 0 : index
    %34 = vector.load %arg6[%c0_16, %c0_17] : memref<32x32xf32, #tpu.memory_space<vmem>>, vector<32x32xf32>
    %cst_18 = arith.constant dense<0.000000e+00> : vector<8x32xf32>
    %35 = tpu.matmul %31, %34, %cst_18 {dimension_numbers = #tpu.dot_dimension_numbers<[1], [0], [0], [1], [0, 0, 1, 1], [], []>} : vector<8x32xf32>, vector<32x32xf32>, vector<8x32xf32> -> vector<8x32xf32>
    %c0_19 = arith.constant 0 : index
    %c0_20 = arith.constant 0 : index
    %36 = vector.load %arg7[%c0_19, %c0_20] : memref<1x32xf32, #tpu.memory_space<vmem>>, vector<1x32xf32>
    %37 = vector.broadcast %36 : vector<1x32xf32> to vector<8x32xf32>
    %38 = arith.addf %35, %37 : vector<8x32xf32>
    %c0_21 = arith.constant 0 : index
    %c0_22 = arith.constant 0 : index
    %39 = vector.load %arg8[%c0_21, %c0_22] : memref<32x32xf32, #tpu.memory_space<vmem>>, vector<32x32xf32>
    %cst_23 = arith.constant dense<0.000000e+00> : vector<8x32xf32>
    %40 = tpu.matmul %32, %39, %cst_23 {dimension_numbers = #tpu.dot_dimension_numbers<[1], [0], [0], [1], [0, 0, 1, 1], [], []>} : vector<8x32xf32>, vector<32x32xf32>, vector<8x32xf32> -> vector<8x32xf32>
    %c0_24 = arith.constant 0 : index
    %c0_25 = arith.constant 0 : index
    %41 = vector.load %arg9[%c0_24, %c0_25] : memref<1x32xf32, #tpu.memory_space<vmem>>, vector<1x32xf32>
    %42 = vector.broadcast %41 : vector<1x32xf32> to vector<8x32xf32>
    %43 = arith.addf %40, %42 : vector<8x32xf32>
    %c0_26 = arith.constant 0 : index
    %c0_27 = arith.constant 0 : index
    %44 = vector.load %arg10[%c0_26, %c0_27] : memref<32x32xf32, #tpu.memory_space<vmem>>, vector<32x32xf32>
    %cst_28 = arith.constant dense<0.000000e+00> : vector<8x32xf32>
    %45 = tpu.matmul %33, %44, %cst_28 {dimension_numbers = #tpu.dot_dimension_numbers<[1], [0], [0], [1], [0, 0, 1, 1], [], []>} : vector<8x32xf32>, vector<32x32xf32>, vector<8x32xf32> -> vector<8x32xf32>
    %c0_29 = arith.constant 0 : index
    %c0_30 = arith.constant 0 : index
    %46 = vector.load %arg11[%c0_29, %c0_30] : memref<1x32xf32, #tpu.memory_space<vmem>>, vector<1x32xf32>
    %47 = vector.broadcast %46 : vector<1x32xf32> to vector<8x32xf32>
    %48 = arith.addf %45, %47 : vector<8x32xf32>
    %49 = vector.extract_strided_slice %38 {offsets = [0, 0], sizes = [8, 8], strides = [1, 1]} : vector<8x32xf32> to vector<8x8xf32>
    %50 = vector.shape_cast %49 : vector<8x8xf32> to vector<1x8x8xf32>
    %51 = vector.extract_strided_slice %43 {offsets = [0, 0], sizes = [8, 8], strides = [1, 1]} : vector<8x32xf32> to vector<8x8xf32>
    %52 = vector.shape_cast %51 : vector<8x8xf32> to vector<1x8x8xf32>
    %53 = vector.extract_strided_slice %48 {offsets = [0, 0], sizes = [8, 8], strides = [1, 1]} : vector<8x32xf32> to vector<8x8xf32>
    %54 = vector.shape_cast %53 : vector<8x8xf32> to vector<1x8x8xf32>
    "tpu.trace_start"() <{level = 10 : i32, message = "bqd,bkd->bqk"}> : () -> ()
    %cst_31 = arith.constant dense<0.000000e+00> : vector<1x8x8xf32>
    %55 = tpu.matmul %50, %52, %cst_31 {dimension_numbers = #tpu.dot_dimension_numbers<[2], [2], [1], [1], [0, 0, 0, 1, 1, 1], [0], [0]>} : vector<1x8x8xf32>, vector<1x8x8xf32>, vector<1x8x8xf32> -> vector<1x8x8xf32>
    "tpu.trace_stop"() : () -> ()
    %cst_32 = arith.constant dense<0xFF800000> : vector<1x8xf32>
    %56 = vector.multi_reduction <maximumf>, %55, %cst_32 [2] : vector<1x8x8xf32> to vector<1x8xf32>
    %57 = vector.shape_cast %56 : vector<1x8xf32> to vector<1x8x1xf32>
    %58 = vector.broadcast %57 : vector<1x8x1xf32> to vector<1x8x8xf32>
    %59 = arith.subf %55, %58 : vector<1x8x8xf32>
    %60 = math.exp %59 : vector<1x8x8xf32>
    %cst_33 = arith.constant dense<0.000000e+00> : vector<1x8xf32>
    %61 = vector.multi_reduction <add>, %60, %cst_33 [2] : vector<1x8x8xf32> to vector<1x8xf32>
    %62 = vector.shape_cast %61 : vector<1x8xf32> to vector<1x8x1xf32>
    %63 = tpu.reciprocal %62 {approx = true} : vector<1x8x1xf32> -> vector<1x8x1xf32>
    %64 = vector.broadcast %63 : vector<1x8x1xf32> to vector<1x8x8xf32>
    %65 = arith.mulf %60, %64 : vector<1x8x8xf32>
    "tpu.trace_start"() <{level = 10 : i32, message = "bqk,bkd->bqd"}> : () -> ()
    %cst_34 = arith.constant dense<0.000000e+00> : vector<1x8x8xf32>
    %66 = tpu.matmul %65, %54, %cst_34 {dimension_numbers = #tpu.dot_dimension_numbers<[2], [1], [1], [2], [0, 0, 0, 1, 1, 2], [0], [0]>} : vector<1x8x8xf32>, vector<1x8x8xf32>, vector<1x8x8xf32> -> vector<1x8x8xf32>
    "tpu.trace_stop"() : () -> ()
    %67 = vector.shape_cast %66 : vector<1x8x8xf32> to vector<8x8xf32>
    %c0_35 = arith.constant 0 : index
    %c0_36 = arith.constant 0 : index
    %68 = vector.load %arg15[%c0_35, %c0_36] : memref<8x32xf32, #tpu.memory_space<vmem>>, vector<8x8xf32>
    tpu.vector_store %arg15[%c0_35, %c0_36], %67 {strides = array<i32>} : memref<8x32xf32, #tpu.memory_space<vmem>>, vector<8x8xf32>,
    %69 = vector.extract_strided_slice %38 {offsets = [0, 8], sizes = [8, 8], strides = [1, 1]} : vector<8x32xf32> to vector<8x8xf32>
    %70 = vector.shape_cast %69 : vector<8x8xf32> to vector<1x8x8xf32>
    %71 = vector.extract_strided_slice %43 {offsets = [0, 8], sizes = [8, 8], strides = [1, 1]} : vector<8x32xf32> to vector<8x8xf32>
    %72 = vector.shape_cast %71 : vector<8x8xf32> to vector<1x8x8xf32>
    %73 = vector.extract_strided_slice %48 {offsets = [0, 8], sizes = [8, 8], strides = [1, 1]} : vector<8x32xf32> to vector<8x8xf32>
    %74 = vector.shape_cast %73 : vector<8x8xf32> to vector<1x8x8xf32>
    "tpu.trace_start"() <{level = 10 : i32, message = "bqd,bkd->bqk"}> : () -> ()
    %cst_37 = arith.constant dense<0.000000e+00> : vector<1x8x8xf32>
    %75 = tpu.matmul %70, %72, %cst_37 {dimension_numbers = #tpu.dot_dimension_numbers<[2], [2], [1], [1], [0, 0, 0, 1, 1, 1], [0], [0]>} : vector<1x8x8xf32>, vector<1x8x8xf32>, vector<1x8x8xf32> -> vector<1x8x8xf32>
    "tpu.trace_stop"() : () -> ()
    %cst_38 = arith.constant dense<0xFF800000> : vector<1x8xf32>
    %76 = vector.multi_reduction <maximumf>, %75, %cst_38 [2] : vector<1x8x8xf32> to vector<1x8xf32>
    %77 = vector.shape_cast %76 : vector<1x8xf32> to vector<1x8x1xf32>
    %78 = vector.broadcast %77 : vector<1x8x1xf32> to vector<1x8x8xf32>
    %79 = arith.subf %75, %78 : vector<1x8x8xf32>
    %80 = math.exp %79 : vector<1x8x8xf32>
    %cst_39 = arith.constant dense<0.000000e+00> : vector<1x8xf32>
    %81 = vector.multi_reduction <add>, %80, %cst_39 [2] : vector<1x8x8xf32> to vector<1x8xf32>
    %82 = vector.shape_cast %81 : vector<1x8xf32> to vector<1x8x1xf32>
    %83 = tpu.reciprocal %82 {approx = true} : vector<1x8x1xf32> -> vector<1x8x1xf32>
    %84 = vector.broadcast %83 : vector<1x8x1xf32> to vector<1x8x8xf32>
    %85 = arith.mulf %80, %84 : vector<1x8x8xf32>
    "tpu.trace_start"() <{level = 10 : i32, message = "bqk,bkd->bqd"}> : () -> ()
    %cst_40 = arith.constant dense<0.000000e+00> : vector<1x8x8xf32>
    %86 = tpu.matmul %85, %74, %cst_40 {dimension_numbers = #tpu.dot_dimension_numbers<[2], [1], [1], [2], [0, 0, 0, 1, 1, 2], [0], [0]>} : vector<1x8x8xf32>, vector<1x8x8xf32>, vector<1x8x8xf32> -> vector<1x8x8xf32>
    "tpu.trace_stop"() : () -> ()
    %87 = vector.shape_cast %86 : vector<1x8x8xf32> to vector<8x8xf32>
    %c0_41 = arith.constant 0 : index
    %c8 = arith.constant 8 : index
    %88 = vector.load %arg15[%c0_41, %c8] : memref<8x32xf32, #tpu.memory_space<vmem>>, vector<8x8xf32>
    tpu.vector_store %arg15[%c0_41, %c8], %87 {strides = array<i32>} : memref<8x32xf32, #tpu.memory_space<vmem>>, vector<8x8xf32>,
    %89 = vector.extract_strided_slice %38 {offsets = [0, 16], sizes = [8, 8], strides = [1, 1]} : vector<8x32xf32> to vector<8x8xf32>
    %90 = vector.shape_cast %89 : vector<8x8xf32> to vector<1x8x8xf32>
    %91 = vector.extract_strided_slice %43 {offsets = [0, 16], sizes = [8, 8], strides = [1, 1]} : vector<8x32xf32> to vector<8x8xf32>
    %92 = vector.shape_cast %91 : vector<8x8xf32> to vector<1x8x8xf32>
    %93 = vector.extract_strided_slice %48 {offsets = [0, 16], sizes = [8, 8], strides = [1, 1]} : vector<8x32xf32> to vector<8x8xf32>
    %94 = vector.shape_cast %93 : vector<8x8xf32> to vector<1x8x8xf32>
    "tpu.trace_start"() <{level = 10 : i32, message = "bqd,bkd->bqk"}> : () -> ()
    %cst_42 = arith.constant dense<0.000000e+00> : vector<1x8x8xf32>
    %95 = tpu.matmul %90, %92, %cst_42 {dimension_numbers = #tpu.dot_dimension_numbers<[2], [2], [1], [1], [0, 0, 0, 1, 1, 1], [0], [0]>} : vector<1x8x8xf32>, vector<1x8x8xf32>, vector<1x8x8xf32> -> vector<1x8x8xf32>
    "tpu.trace_stop"() : () -> ()
    %cst_43 = arith.constant dense<0xFF800000> : vector<1x8xf32>
    %96 = vector.multi_reduction <maximumf>, %95, %cst_43 [2] : vector<1x8x8xf32> to vector<1x8xf32>
    %97 = vector.shape_cast %96 : vector<1x8xf32> to vector<1x8x1xf32>
    %98 = vector.broadcast %97 : vector<1x8x1xf32> to vector<1x8x8xf32>
    %99 = arith.subf %95, %98 : vector<1x8x8xf32>
    %100 = math.exp %99 : vector<1x8x8xf32>
    %cst_44 = arith.constant dense<0.000000e+00> : vector<1x8xf32>
    %101 = vector.multi_reduction <add>, %100, %cst_44 [2] : vector<1x8x8xf32> to vector<1x8xf32>
    %102 = vector.shape_cast %101 : vector<1x8xf32> to vector<1x8x1xf32>
    %103 = tpu.reciprocal %102 {approx = true} : vector<1x8x1xf32> -> vector<1x8x1xf32>
    %104 = vector.broadcast %103 : vector<1x8x1xf32> to vector<1x8x8xf32>
    %105 = arith.mulf %100, %104 : vector<1x8x8xf32>
    "tpu.trace_start"() <{level = 10 : i32, message = "bqk,bkd->bqd"}> : () -> ()
    %cst_45 = arith.constant dense<0.000000e+00> : vector<1x8x8xf32>
    %106 = tpu.matmul %105, %94, %cst_45 {dimension_numbers = #tpu.dot_dimension_numbers<[2], [1], [1], [2], [0, 0, 0, 1, 1, 2], [0], [0]>} : vector<1x8x8xf32>, vector<1x8x8xf32>, vector<1x8x8xf32> -> vector<1x8x8xf32>
    "tpu.trace_stop"() : () -> ()
    %107 = vector.shape_cast %106 : vector<1x8x8xf32> to vector<8x8xf32>
    %c0_46 = arith.constant 0 : index
    %c16 = arith.constant 16 : index
    %108 = vector.load %arg15[%c0_46, %c16] : memref<8x32xf32, #tpu.memory_space<vmem>>, vector<8x8xf32>
    tpu.vector_store %arg15[%c0_46, %c16], %107 {strides = array<i32>} : memref<8x32xf32, #tpu.memory_space<vmem>>, vector<8x8xf32>,
    %109 = vector.extract_strided_slice %38 {offsets = [0, 24], sizes = [8, 8], strides = [1, 1]} : vector<8x32xf32> to vector<8x8xf32>
    %110 = vector.shape_cast %109 : vector<8x8xf32> to vector<1x8x8xf32>
    %111 = vector.extract_strided_slice %43 {offsets = [0, 24], sizes = [8, 8], strides = [1, 1]} : vector<8x32xf32> to vector<8x8xf32>
    %112 = vector.shape_cast %111 : vector<8x8xf32> to vector<1x8x8xf32>
    %113 = vector.extract_strided_slice %48 {offsets = [0, 24], sizes = [8, 8], strides = [1, 1]} : vector<8x32xf32> to vector<8x8xf32>
    %114 = vector.shape_cast %113 : vector<8x8xf32> to vector<1x8x8xf32>
    "tpu.trace_start"() <{level = 10 : i32, message = "bqd,bkd->bqk"}> : () -> ()
    %cst_47 = arith.constant dense<0.000000e+00> : vector<1x8x8xf32>
    %115 = tpu.matmul %110, %112, %cst_47 {dimension_numbers = #tpu.dot_dimension_numbers<[2], [2], [1], [1], [0, 0, 0, 1, 1, 1], [0], [0]>} : vector<1x8x8xf32>, vector<1x8x8xf32>, vector<1x8x8xf32> -> vector<1x8x8xf32>
    "tpu.trace_stop"() : () -> ()
    %cst_48 = arith.constant dense<0xFF800000> : vector<1x8xf32>
    %116 = vector.multi_reduction <maximumf>, %115, %cst_48 [2] : vector<1x8x8xf32> to vector<1x8xf32>
    %117 = vector.shape_cast %116 : vector<1x8xf32> to vector<1x8x1xf32>
    %118 = vector.broadcast %117 : vector<1x8x1xf32> to vector<1x8x8xf32>
    %119 = arith.subf %115, %118 : vector<1x8x8xf32>
    %120 = math.exp %119 : vector<1x8x8xf32>
    %cst_49 = arith.constant dense<0.000000e+00> : vector<1x8xf32>
    %121 = vector.multi_reduction <add>, %120, %cst_49 [2] : vector<1x8x8xf32> to vector<1x8xf32>
    %122 = vector.shape_cast %121 : vector<1x8xf32> to vector<1x8x1xf32>
    %123 = tpu.reciprocal %122 {approx = true} : vector<1x8x1xf32> -> vector<1x8x1xf32>
    %124 = vector.broadcast %123 : vector<1x8x1xf32> to vector<1x8x8xf32>
    %125 = arith.mulf %120, %124 : vector<1x8x8xf32>
    "tpu.trace_start"() <{level = 10 : i32, message = "bqk,bkd->bqd"}> : () -> ()
    %cst_50 = arith.constant dense<0.000000e+00> : vector<1x8x8xf32>
    %126 = tpu.matmul %125, %114, %cst_50 {dimension_numbers = #tpu.dot_dimension_numbers<[2], [1], [1], [2], [0, 0, 0, 1, 1, 2], [0], [0]>} : vector<1x8x8xf32>, vector<1x8x8xf32>, vector<1x8x8xf32> -> vector<1x8x8xf32>
    "tpu.trace_stop"() : () -> ()
    %127 = vector.shape_cast %126 : vector<1x8x8xf32> to vector<8x8xf32>
    %c0_51 = arith.constant 0 : index
    %c24 = arith.constant 24 : index
    %128 = vector.load %arg15[%c0_51, %c24] : memref<8x32xf32, #tpu.memory_space<vmem>>, vector<8x8xf32>
    tpu.vector_store %arg15[%c0_51, %c24], %127 {strides = array<i32>} : memref<8x32xf32, #tpu.memory_space<vmem>>, vector<8x8xf32>,
    %c0_52 = arith.constant 0 : index
    %c0_53 = arith.constant 0 : index
    %129 = vector.load %arg15[%c0_52, %c0_53] : memref<8x32xf32, #tpu.memory_space<vmem>>, vector<8x32xf32>
    %c0_54 = arith.constant 0 : index
    %c0_55 = arith.constant 0 : index
    %130 = vector.load %arg12[%c0_54, %c0_55] : memref<32x32xf32, #tpu.memory_space<vmem>>, vector<32x32xf32>
    %cst_56 = arith.constant dense<0.000000e+00> : vector<8x32xf32>
    %131 = tpu.matmul %129, %130, %cst_56 {dimension_numbers = #tpu.dot_dimension_numbers<[1], [0], [0], [1], [0, 0, 1, 1], [], []>} : vector<8x32xf32>, vector<32x32xf32>, vector<8x32xf32> -> vector<8x32xf32>
    %c0_57 = arith.constant 0 : index
    %c0_58 = arith.constant 0 : index
    %132 = vector.load %arg13[%c0_57, %c0_58] : memref<1x32xf32, #tpu.memory_space<vmem>>, vector<1x32xf32>
    %133 = vector.broadcast %132 : vector<1x32xf32> to vector<8x32xf32>
    %134 = arith.addf %131, %133 : vector<8x32xf32>
    %135 = arith.addf %134, %1 : vector<8x32xf32>
    %136 = vector.shape_cast %135 : vector<8x32xf32> to vector<1x8x32xf32>
    %c0_59 = arith.constant 0 : index
    %c0_60 = arith.constant 0 : index
    %c0_61 = arith.constant 0 : index
    %137 = vector.load %arg14[%c0_59, %c0_60, %c0_61] : memref<1x8x32xf32, #tpu.memory_space<vmem>>, vector<1x8x32xf32>
    tpu.vector_store %arg14[%c0_59, %c0_60, %c0_61], %136 {strides = array<i32>} : memref<1x8x32xf32, #tpu.memory_space<vmem>>, vector<1x8x32xf32>,
    return
  }
  func.func @transform_0(%arg0: i32) -> (i32, i32, i32) {
    %c0_i32 = arith.constant 0 : i32
    %c0_i32_0 = arith.constant 0 : i32
    %c0_i32_1 = arith.constant 0 : i32
    return %arg0, %c0_i32, %c0_i32_0 : i32, i32, i32
  }
  func.func @transform_1(%arg0: i32) -> (i32, i32) {
    %c0_i32 = arith.constant 0 : i32
    %c0_i32_0 = arith.constant 0 : i32
    %c0_i32_1 = arith.constant 0 : i32
    return %c0_i32, %c0_i32_0 : i32, i32
  }
  func.func @transform_2(%arg0: i32) -> (i32, i32) {
    %c0_i32 = arith.constant 0 : i32
    %c0_i32_0 = arith.constant 0 : i32
    %c0_i32_1 = arith.constant 0 : i32
    return %c0_i32, %c0_i32_0 : i32, i32
  }
  func.func @transform_3(%arg0: i32) -> (i32, i32) {
    %c0_i32 = arith.constant 0 : i32
    %c0_i32_0 = arith.constant 0 : i32
    %c0_i32_1 = arith.constant 0 : i32
    return %c0_i32, %c0_i32_0 : i32, i32
  }
  func.func @transform_4(%arg0: i32) -> (i32, i32) {
    %c0_i32 = arith.constant 0 : i32
    %c0_i32_0 = arith.constant 0 : i32
    %c0_i32_1 = arith.constant 0 : i32
    return %c0_i32, %c0_i32_0 : i32, i32
  }
  func.func @transform_5(%arg0: i32) -> (i32, i32) {
    %c0_i32 = arith.constant 0 : i32
    %c0_i32_0 = arith.constant 0 : i32
    %c0_i32_1 = arith.constant 0 : i32
    return %c0_i32, %c0_i32_0 : i32, i32
  }
  func.func @transform_6(%arg0: i32) -> (i32, i32) {
    %c0_i32 = arith.constant 0 : i32
    %c0_i32_0 = arith.constant 0 : i32
    %c0_i32_1 = arith.constant 0 : i32
    return %c0_i32, %c0_i32_0 : i32, i32
  }
  func.func @transform_7(%arg0: i32) -> (i32, i32) {
    %c0_i32 = arith.constant 0 : i32
    %c0_i32_0 = arith.constant 0 : i32
    %c0_i32_1 = arith.constant 0 : i32
    return %c0_i32, %c0_i32_0 : i32, i32
  }
  func.func @transform_8(%arg0: i32) -> (i32, i32) {
    %c0_i32 = arith.constant 0 : i32
    %c0_i32_0 = arith.constant 0 : i32
    %c0_i32_1 = arith.constant 0 : i32
    return %c0_i32, %c0_i32_0 : i32, i32
  }
  func.func @transform_9(%arg0: i32) -> (i32, i32) {
    %c0_i32 = arith.constant 0 : i32
    %c0_i32_0 = arith.constant 0 : i32
    %c0_i32_1 = arith.constant 0 : i32
    return %c0_i32, %c0_i32_0 : i32, i32
  }
  func.func @transform_10(%arg0: i32) -> (i32, i32) {
    %c0_i32 = arith.constant 0 : i32
    %c0_i32_0 = arith.constant 0 : i32
    %c0_i32_1 = arith.constant 0 : i32
    return %c0_i32, %c0_i32_0 : i32, i32
  }
  func.func @transform_11(%arg0: i32) -> (i32, i32) {
    %c0_i32 = arith.constant 0 : i32
    %c0_i32_0 = arith.constant 0 : i32
    %c0_i32_1 = arith.constant 0 : i32
    return %c0_i32, %c0_i32_0 : i32, i32
  }
  func.func @transform_12(%arg0: i32) -> (i32, i32) {
    %c0_i32 = arith.constant 0 : i32
    %c0_i32_0 = arith.constant 0 : i32
    %c0_i32_1 = arith.constant 0 : i32
    return %c0_i32, %c0_i32_0 : i32, i32
  }
  func.func @transform_13(%arg0: i32) -> (i32, i32, i32) {
    %c0_i32 = arith.constant 0 : i32
    %c0_i32_0 = arith.constant 0 : i32
    %c0_i32_1 = arith.constant 0 : i32
    return %arg0, %c0_i32, %c0_i32_0 : i32, i32, i32
  }
}

</mosaic_0001>

<bundles_post_ra>
// kernel: tpu_custom_call.1
= control target key start
LH: loop header
LB: loop body
LE: loop exit
PB: predicated region body
PF: predicated region fallthrough
CT: control target
= control target key end

     0   :  { %s1985_s0 = inlined_call_operand.hbm [shape: f32[2,8,32], index: 0, kind: input, shape index: {}]   ;;  %s1986_s1 = inlined_call_operand.hbm [shape: f32[1,32], index: 1, kind: input, shape index: {}]   ;;  %s1987_s2 = inlined_call_operand.vmem [shape: f32[1,32], index: 2, kind: input, shape index: {}]   ;;  %s1988_s3 = inlined_call_operand.hbm [shape: f32[32,96], index: 3, kind: input, shape index: {}]   ;;  %s1989_s4 = inlined_call_operand.vmem [shape: f32[1,96], index: 4, kind: input, shape index: {}]   ;;  %s1990_s5 = inlined_call_operand.hbm [shape: f32[32,32], index: 5, kind: input, shape index: {}]   ;;  %s1991_s6 = inlined_call_operand.vmem [shape: f32[1,32], index: 6, kind: input, shape index: {}]   ;;  %s1992_s7 = inlined_call_operand.hbm [shape: f32[32,32], index: 7, kind: input, shape index: {}]   ;;  %s1993_s8 = inlined_call_operand.vmem [shape: f32[1,32], index: 8, kind: input, shape index: {}]   ;;  %s1994_s9 = inlined_call_operand.hbm [shape: f32[32,32], index: 9, kind: input, shape index: {}]   ;;  %s1995_s10 = inlined_call_operand.vmem [shape: f32[1,32], index: 10, kind: input, shape index: {}]   ;;  %s1996_s11 = inlined_call_operand.hbm [shape: f32[32,32], index: 11, kind: input, shape index: {}]   ;;  %s1997_s12 = inlined_call_operand.vmem [shape: f32[1,32], index: 12, kind: input, shape index: {}]   ;;  %s1998_s13 = inlined_call_operand.hbm [shape: f32[2,8,32], index: 13, kind: output, shape index: {}]  }
   0x1   :  { %2000 = sst [smem:[#allocation21_spill]] %s1986_s1 }
   0x2   :  { %2001 = sst [smem:[#allocation22_spill]] %s1988_s3 }
   0x3   :  { %2002 = sst [smem:[#allocation23_spill]] %s1990_s5 }
   0x4   :  { %2003 = sst [smem:[#allocation24_spill]] %s1992_s7 }
   0x5   :  { %2004 = sst [smem:[#allocation25_spill]] %s1994_s9 }
   0x6   :  { %2005 = sst [smem:[#allocation26_spill]] %s1995_s10 }
   0x7   :  { %2006 = sst [smem:[#allocation27_spill]] %s1997_s12 }
   0x8   :  { %2007 = sst [smem:[#allocation28_spill]] %s1998_s13 }
   0x9   :  { %18 = vsyncpa [#allocation4], 0 }
   0xa   :  { %20 = vsyncpa [#allocation4 + $0x1], 0 }
   0xb   :  { %21 = vsyncpa [#allocation7], 0 }
   0xc   :  { %22 = vsyncpa [#allocation10], 0 }
   0xd   :  { %23 = vsyncpa [#allocation13], 0 }
   0xe   :  { %24 = vsyncpa [#allocation5], 0 }
   0xf   :  { %26 = vsyncpa [#allocation5 + $0x1], 0  ;;  %s1739_s25 = smov 0   ;;  %s1741_s26 = smov 0  }
  0x10   :  { %s1743_s27 = smov 0   ;;  %s1745_s28 = smov 0  }
  0x11 LB: > { %s2008_s1 = sld [smem:[#allocation21_spill]]  ;;  %s1763_s15 = sadd.s32 4294967295, %s1650_s28   ;;  %s1650_s28 = sphi %s1745_s28, %s2027_s28   ;;  %s1646_s27 = sphi %s1743_s27, %s2026_s27   ;;  %s1642_s26 = sphi %s1741_s26, %s2025_s26   ;;  %s1638_s25 = sphi %s1739_s25, %s2024_s25  }
  0x12   : > { %p1177_p0 = scmp.ge.s32.totalorder %s1650_s28, 1  ;;  %p53_p1 = scmp.eq.s32.totalorder %s1763_s15, 0 }
  0x13   : > { %p341_p2 = scmp.lt.s32.totalorder %s1650_s28, 3  ;;  %s1652_s17 = smov [#allocation6]  }
  0x14   : > { %s355_s18 = sshll.u32 %s1652_s17, 4  ;;  %s2010_s5 = sld [smem:[#allocation23_spill]]  ;;  %s356_s18 = int_to_ptr.vmem [resolvable:$true] %s355_s18 }
  0x15   : > { %p1768_p3 = pnand %p1177_p0, %p341_p2  ;;  %s2012_s9 = sld [smem:[#allocation25_spill]] }
  0x16   : > { %s1653_s30 = smov [#allocation9]   ;;  %s1654_s19 = smov 128  }
  0x17   : > { %s353_s14 = sshll.u32 %s2008_s1, 4  ;;  %p1245_p5 = pneg %p1768_p3  ;;  %s354_s14 = int_to_ptr.hbm [resolvable:$true] %s353_s14 }
  0x18   : > { %s386_s17 = sshll.u32 %s1653_s30, 4  ;;  %s1655_s20 = smov 8   ;;  %s387_s17 = int_to_ptr.vmem [resolvable:$true] %s386_s17 }
  0x19   : > { %p1780_p6 = pnand %p1245_p5, %p53_p1  ;;  %s2013_s3 = sld [smem:[#allocation22_spill]] }
  0x1a   : > { %s384_s21 = sshll.u32 %s2010_s5, 4  ;;  %s1656_s12 = smov [#allocation12]   ;;  %s385_s21 = int_to_ptr.hbm [resolvable:$true] %s384_s21 }
  0x1b   : > { %s418_s29 = sshll.u32 %s2012_s9, 4  ;;  %s420_s10 = sshll.u32 %s1656_s12, 4  ;;  %s419_s29 = int_to_ptr.hbm [resolvable:$true] %s418_s29  ;;  %s421_s10 = int_to_ptr.vmem [resolvable:$true] %s420_s10 }
  0x1c   : > { %1248 = dma.hbm_to_vmem [thread:$0]  (!%p1780_p6), %s354_s14, 16, %s356_s18, [#allocation7]  }
  0x1d   : > { %1254 = dma.hbm_to_vmem [thread:$0]  (!%p1780_p6), %s385_s21, 512, %s387_s17, [#allocation10], %s1654_s19, %s1654_s19, %s1655_s20  }
  0x1e   : > { %1260 = dma.hbm_to_vmem [thread:$0]  (!%p1780_p6), %s419_s29, 512, %s421_s10, [#allocation13], %s1654_s19, %s1654_s19, %s1655_s20  }
  0x1f   : > { %s367_s13 = sshll.u32 %s2013_s3, 4  ;;  %s1657_s14 = smov [#allocation8]   ;;  %s368_s13 = int_to_ptr.hbm [resolvable:$true] %s367_s13 }
  0x20   : > { %s369_s18 = sshll.u32 %s1657_s14, 4  ;;  %s2014_s7 = sld [smem:[#allocation24_spill]]  ;;  %s370_s18 = int_to_ptr.vmem [resolvable:$true] %s369_s18 }
  0x21   : > { %1251 = dma.hbm_to_vmem [thread:$0]  (!%p1780_p6), %s368_s13, 512, %s370_s18, [#allocation7], %s1654_s19, %s1654_s19, %s1655_s20  }
  0x22   : > { %s435_s10 = sshll.u32 %s1996_s11, 4  ;;  %s1658_s12 = smov [#allocation11]   ;;  %s436_s10 = int_to_ptr.hbm [resolvable:$true] %s435_s10 }
  0x23   : > { %s403_s29 = sshll.u32 %s1658_s12, 4  ;;  %s1659_s30 = smov [#allocation14]   ;;  %s404_s29 = int_to_ptr.vmem [resolvable:$true] %s403_s29 }
  0x24   : > { %s437_s13 = sshll.u32 %s1659_s30, 4  ;;  %s1176_s17 = sadd.s32 4294967294, %s1650_s28   ;;  %s438_s13 = int_to_ptr.vmem [resolvable:$true] %s437_s13 }
  0x25   : > { %1263 = dma.hbm_to_vmem [thread:$0]  (!%p1780_p6), %s436_s10, 512, %s438_s13, [#allocation13], %s1654_s19, %s1654_s19, %s1655_s20  }
  0x26   : > { %s401_s21 = sshll.u32 %s2014_s7, 4  ;;  %s1810_s14 = sadd.s32 1, %s1650_s28   ;;  %s402_s21 = int_to_ptr.hbm [resolvable:$true] %s401_s21 }
  0x27   : > { %1257 = dma.hbm_to_vmem [thread:$0]  (!%p1780_p6), %s402_s21, 512, %s404_s29, [#allocation10], %s1654_s19, %s1654_s19, %s1655_s20  }
  0x28   : > { %s36_s18 = ssub.s32 %s1650_s28, %s1810_s14  ;;  %s39_s23 = sadd.s32 1, %s1646_s27 }
  0x29   : > { %p37_p7 = scmp.eq.s32.totalorder %s36_s18, 0  ;;  %p46_p8 = scmp.ne.s32.totalorder %s1646_s27, %s1642_s26 }
  0x2a   : > { %p47_p9 = scmp.eq.s32.totalorder %s1650_s28, 0  ;;  %p52_p10 = scmp.ne.s32.totalorder %s1642_s26, %s1638_s25 }
  0x2b   : > { %s1821_s24 = scalar_select %p37_p7, %s1646_s27, %s39_s23  }
  0x2c   : > { %p1823_p11 = por %p47_p9, %p46_p8  ;;  %p1829_p12 = por %p53_p1, %p52_p10 }
  0x2d   : > { %p328_p13 = scmp.eq.s32.totalorder %s1763_s15, 1  ;;  %p334_p0 = scmp.eq.s32.totalorder %s1176_s17, 1 }
  0x2e   : > { %p1278_p2 = scmp.lt.s32.totalorder %s1650_s28, 2  ;;  %s454_s19 = sand.u32 1, %s1646_s27  }
  0x2f   : > { %p1836_p5 = por %p328_p13, %p46_p8  ;;  %p1840_p6 = por %p334_p0, %p52_p10 }
  0x30   : > { %s1185_s5 = sshll.u32 %s454_s19, 3  ;;  %s1186_s10 = sshll.u32 %s1650_s28, 3 }
  0x31   : > { %s462_s30 = scalar_lea.hbm %s1985_s0, %s1186_s10  ;;  %s458_s13 = scalar_lea.vmem [#allocation3], %s1185_s5 }
  0x32   : > { %s466_s18 = sshll.u32 %s458_s13, 4  ;;  %s464_s23 = sshll.u32 %s462_s30, 4  ;;  %s467_s18 = int_to_ptr.vmem [resolvable:$true] %s466_s18  ;;  %s465_s23 = int_to_ptr.hbm [resolvable:$true] %s464_s23 }
  0x33   : > { %p1850_p7 = pnand %p1278_p2, %p1823_p11  ;;  %s455_s3 = scalar_lea.sflag [#allocation4], %s454_s19 }
  0x34   : > { %s1542_s7 = sshra.s32 %s465_s23, 4  ;;  %s1549_s12 = scalar_lea.hbm %s1985_s0, 16  ;;  %s1543_s7 = int_to_ptr.hbm [resolvable:$true] %s1542_s7 }
  0x35   : > { %s1544_s9 = scalar_lea.hbm %s1543_s7, 8  ;;  %p1546_p9 = pneg %p1850_p7 }
  0x36   : > { %p1545_p8 = scmp.ne.s32.totalorder %s1543_s7, %s1544_s9  ;;  %p1550_p11 = scmp.lt.s32.totalorder %s1543_s7, %s1985_s0 }
  0x37   : > { %p1551_p0 = scmp.lt.s32.totalorder %s1549_s12, %s1544_s9 }
  0x38   : > { %p1547_p10 = pnand %p1546_p9, %p1545_p8 }
  0x39   : > { %p1552_p2 = por %p1551_p0, %p1550_p11 }
  0x3a   : > { %p1548_p13 = pneg %p1547_p10 }
  0x3c   : > { %p1553_p4 = pnand %p1552_p2, %p1548_p13 }
  0x3e   : > { %1556 = shalt.err (!%p1553_p4)
}
  0x3f   : > { %1267 = dma.hbm_to_vmem [thread:$0]  (!%p1850_p7), %s465_s23, 128, %s467_s18, %s455_s3  }
  0x40   : > { %475 = sbr.rel (%p1768_p3) target bundleno = 1636 (0x664), region = 72  ;;  %s1867_s19 = sand.u32 (!%p1768_p3), 1, %s1642_s26  }
  0x41   : > { %s1188_s30 = sshll.u32 (!%p1768_p3), %s1867_s19, 3  ;;  %s478_s13 = scalar_lea.sflag (!%p1768_p3), [#allocation4], %s1867_s19 }
  0x42   : > { %s481_s7 = scalar_lea.vmem (!%p1768_p3), [#allocation3], %s1188_s30 }
  0x45   : > { %1617 = dma.done.wait (%p1829_p12), %s478_s13, 128  }
  0x46   : > { %1619 = vsyncadd (%p1829_p12), %s478_s13, 4294967168 }
  0x47   : > { %1621 = dma.done.wait (%p53_p1), [#allocation7], 528  }
  0x48   : > { %1623 = vsyncadd (%p53_p1), [#allocation7], 4294966768 }
  0x49   : > { %1625 = dma.done.wait (%p53_p1), [#allocation10], 1024  }
  0x4a   : > { %1627 = vsyncadd (%p53_p1), [#allocation10], 4294966272 }
  0x4b   : > { %1629 = dma.done.wait (%p53_p1), [#allocation13], 1024  }
  0x4c   : > { %1631 = vsyncadd (%p53_p1), [#allocation13], 4294966272  ;;  %vm556_vm0 = vcmask 261120   ;;  %v1889_v0 = vld [vmem:[%s481_s7] sm:$0xff]  ;;  %v1660_v2 = vmov 32.0   ;;  %v596_v17 = vld [vmem:[#allocation8] sm:$0xff] }
  0x4d   : > { %v557_v1 = vsel %vm556_vm0, %v1889_v0, 0.0  ;;  %1342 = vrcp.f32 %v1660_v2  ;;  %v599_v14 = vld [vmem:[#allocation8 + $0x18] sm:$0xff]  ;;  %v598_v15 = vld [vmem:[#allocation8 + $0x10] sm:$0xff]  ;;  %v597_v16 = vld [vmem:[#allocation8 + $0x8] sm:$0xff]  ;;  %s1661_s18 = smov 96   ;;  %s1662_s5 = smov 104  }
  0x4e   : > { %558 = vadd.xlane.f32.xlu0 %v557_v1  ;;  %619 = vmatpush.msra.mxu0 %v599_v14  ;;  %v631_v18 = vld [vmem:[#allocation9 + $0x18] sm:$0xff]  ;;  %v1336_v31 = vld [vmem:[%s1987_s2] ss:$0 sm:$0xff]  ;;  %v630_v34 = vld [vmem:[#allocation9 + $0x10] sm:$0xff]  ;;  %s1663_s10 = smov 120   ;;  %vm723_vm5 = vcmask 64512  }
  0x4f   : > { %651 = vmatpush.msra.mxu1 %v631_v18  ;;  %v1335_v28 = vld [vmem:[#allocation6] ss:$0 sm:$0xff]  ;;  %v629_v35 = vld [vmem:[#allocation9 + $0x8] sm:$0xff]  ;;  %v628_v36 = vld [vmem:[#allocation9] sm:$0xff]  ;;  %s1664_s21 = smov 112   ;;  %s1665_s13 = smov 64  }
  0x50   : > { %620 = vmatpush.msra.mxu0 %v598_v15  ;;  %v662_v37 = vld [vmem:[#allocation11 + $0x18] sm:$0xff]  ;;  %v661_v38 = vld [vmem:[#allocation11 + $0x10] sm:$0xff]  ;;  %v660_v39 = vld [vmem:[#allocation11 + $0x8] sm:$0xff]  ;;  %s2020_s9 = sld [smem:[#allocation26_spill]]  ;;  %s1666_s16 = smov 8   ;;  %vm855_vm6 = vcmask 130112  }
  0x51   : > { %652 = vmatpush.msra.mxu1 %v630_v34  ;;  %683 = vmatpush.msra.mxu2 %v662_v37  ;;  %v659_v40 = vld [vmem:[#allocation11] sm:$0xff]  ;;  %v694_v52 = vld [vmem:[#allocation12 + $0x18] sm:$0xff]  ;;  %v693_v53 = vld [vmem:[#allocation12 + $0x10] sm:$0xff]  ;;  %s1667_s22 = smov 16   ;;  %vm926_vm7 = vcmask 195712   ;;  %vm997_vm8 = vcmask 261312  }
  0x52   : > { %621 = vmatpush.msra.mxu0 %v597_v16  ;;  %v1337_v41 = vld [vmem:[%s1989_s4] ss:$0 sm:$0xff]  ;;  %715 = vmatpush.msra.mxu3 %v694_v52  ;;  %v692_v54 = vld [vmem:[#allocation12 + $0x8] sm:$0xff]  ;;  %v1002_v52 = vld [vmem:[#allocation14 + $0x10] sm:$0xff]  ;;  %s1214_s23 = sshll.u32 %s1763_s15, 3  ;;  %s554_s7 = scalar_lea.vmem [#allocation15], %s1188_s30 }
  0x53   : > { %v1343_v3 = vpop.eup %1342  ;;  %653 = vmatpush.msra.mxu1 %v629_v35  ;;  %684 = vmatpush.msra.mxu2 %v661_v38  ;;  %v1338_v46 = vld [vmem:[%s1991_s6] ss:$0 sm:$0xff]  ;;  %s1046_s3 = sshll.u32 %s554_s7, 4  ;;  %s1034_s15 = scalar_lea.sflag [#allocation5], %s1867_s19  ;;  %s1047_s3 = int_to_ptr.vmem [resolvable:$true] %s1046_s3 }
  0x54   : > { %v561_v4 = vmul.f32 32.0, %v1343_v3  ;;  %vm565_vm1 = vweird.f32 %v1343_v3  ;;  %622 = vmatpush.msra.mxu0 %v596_v17  ;;  %v1339_v49 = vld [vmem:[%s1993_s8] ss:$0 sm:$0xff]  ;;  %716 = vmatpush.msra.mxu3 %v693_v53  ;;  %v1001_v53 = vld [vmem:[#allocation14 + $0x8] sm:$0xff] }
  0x55   : > { %654 = vmatpush.msra.mxu1 %v628_v36  ;;  %685 = vmatpush.msra.mxu2 %v660_v39  ;;  %v691_v55 = vld [vmem:[#allocation12] sm:$0xff] }
  0x56   : > { %v562_v5 = vsub.f32 1.0, %v561_v4  ;;  %717 = vmatpush.msra.mxu3 %v692_v54  ;;  %v1000_v54 = vld [vmem:[#allocation14] sm:$0xff] }
  0x57   : > { %686 = vmatpush.msra.mxu2 %v659_v40 }
  0x58   : > { %v563_v6 = vmul.f32 %v1343_v3, %v562_v5  ;;  %718 = vmatpush.msra.mxu3 %v691_v55 }
  0x5a   : > { %v564_v7 = vadd.f32 %v1343_v3, %v563_v6 }
  0x5c   : > { %v566_v8 = vsel %vm565_vm1, %v1343_v3, %v564_v7 }
  0xc1   : > { %v559_v9 = vpop.xlane.xlu0 %558 }
  0xc2   : > { %v567_v10 = vmul.f32 %v566_v8, %v559_v9 }
  0xc4   : > { %v568_v11 = vsub.f32 %v1889_v0, %v567_v10 }
  0xc6   : > { %v569_v12 = vmul.f32 %v568_v11, %v568_v11 }
  0xc8   : > { %v570_v13 = vsel %vm556_vm0, %v569_v12, 0.0 }
  0xc9   : > { %571 = vadd.xlane.f32.xlu0 %v570_v13  ;;  %v1340_v13 = vld [vmem:[%s2020_s9] ss:$0 sm:$0xff] }
 0x13c   : > { %v572_v19 = vpop.xlane.xlu0 %571 }
 0x13d   : > { %v573_v20 = vmul.f32 %v572_v19, %v566_v8 }
 0x13f   : > { %v574_v21 = vadd.f32 1e-05, %v573_v20 }
 0x141   : > { %1344 = vrsqrt.f32 %v574_v21  ;;  %vm581_vm3 = vweird.f32 %v574_v21 }
 0x147   : > { %v1345_v22 = vpop.eup %1344 }
 0x148   : > { %v576_v23 = vmul.f32 %v1345_v22, %v574_v21  ;;  %vm582_vm2 = vweird.f32 %v1345_v22 }
 0x149   : > { %vm583_vm4 = vmor %vm581_vm3, %vm582_vm2 }
 0x14a   : > { %v577_v24 = vmul.f32 %v1345_v22, %v576_v23 }
 0x14c   : > { %v578_v25 = vmul.f32 0.5, %v577_v24 }
 0x14e   : > { %v579_v26 = vsub.f32 1.5, %v578_v25 }
 0x150   : > { %v580_v27 = vmul.f32 %v1345_v22, %v579_v26 }
 0x152   : > { %v584_v29 = vsel %vm583_vm4, %v1345_v22, %v580_v27 }
 0x153   : > { %v585_v30 = vmul.f32 %v584_v29, %v568_v11 }
 0x155   : > { %v590_v32 = vmul.f32 %v1335_v28, %v585_v30 }
 0x157   : > { %v595_v33 = vadd.f32 %v1336_v31, %v590_v32 }
 0x159   : > { %1196 = vmatmul.msk.f32.vlgmr.msra.gmra.mxu0 %vm556_vm0, %v595_v33 }
 0x1d6   : > { %v624_v42 = vpop.f32.mrf.mxu0 }
 0x1d7   : > { %v625_v43 = vadd.f32 %v1337_v41, %v624_v42 }
 0x1d9   : > { %v627_v44 = vmax.f32 %v625_v43, 0.0 }
 0x1db   : > { %667 = vrot.lane.b32.xlu1 %v627_v44, %s1661_s18  ;;  %1197 = vmatmul.msk.f32.vlgmr.msra.gmra.mxu1 %vm556_vm0, %v627_v44  ;;  %s1668_s18 = smov 24  }
 0x24d   : > { %v668_v45 = vpop.permute.xlu1 %667 }
 0x24e   : > { %1198 = vmatmul.msk.f32.vlgmr.msra.gmra.mxu2 %vm556_vm0, %v668_v45 }
 0x258   : > { %v656_v47 = vpop.f32.mrf.mxu1 }
 0x259   : > { %v657_v48 = vadd.f32 %v1338_v46, %v656_v47 }
 0x25b   : > { %928 = vrot.lane.b32.xlu0 %v657_v48, %s1662_s5  ;;  %785 = vrot.lane.b32.xlu2 %v657_v48, %s1663_s10 }
 0x2b5   : > { %v786_v56 = vpop.permute.xlu2 %785 }
 0x2cd   : > { %v929_v60 = vpop.permute.xlu0 %928 }
 0x2d1   : > { %v688_v50 = vpop.f32.mrf.mxu2 }
 0x2d2   : > { %v689_v51 = vadd.f32 %v1339_v49, %v688_v50 }
 0x2d4   : > { %787 = vrot.lane.b32.xlu1 %v689_v51, %s1663_s10  ;;  %1200 = vmatpush.xpose.msk.msrb.mxu0 %vm723_vm5, %v689_v51 }
 0x2d5   : > { %930 = vrot.lane.b32.xlu2 %v689_v51, %s1662_s5 }
 0x2d7   : > { %1201 = vmatmul.msk.f32.vlgmr.msrb.gmra.mxu0 %vm723_vm5, %v657_v48 }
 0x2dc   : > { %859 = vrot.lane.b32.xlu1 %v689_v51, %s1664_s21  ;;  %v1003_v51 = vld [vmem:[#allocation14 + $0x18] sm:$0xff] }
 0x2dd   : > { %857 = vrot.lane.b32.xlu2 %v657_v48, %s1664_s21 }
 0x2e4   : > { %699 = vrot.lane.b32.xlu1 %v627_v44, %s1665_s13 }
 0x32f   : > { %v931_v58 = vpop.permute.xlu2 %930 }
 0x337   : > { %v858_v61 = vpop.permute.xlu2 %857 }
 0x346   : > { %v788_v57 = vpop.permute.xlu1 %787 }
 0x347   : > { %1203 = vmatpush.xpose.msk.msrb.mxu2 %vm723_vm5, %v788_v57 }
 0x34a   : > { %1204 = vmatmul.msk.f32.vlgmr.msrb.gmra.mxu2 %vm723_vm5, %v786_v56 }
 0x34b   : > { %1209 = vmatpush.xpose.msk.msra.mxu2 %vm723_vm5, %v931_v58 }
 0x34e   : > { %v860_v59 = vpop.permute.xlu1 %859 }
 0x34f   : > { %1206 = vmatpush.xpose.msk.msra.mxu0 %vm723_vm5, %v860_v59 }
 0x352   : > { %1207 = vmatmul.msk.f32.vlgmr.msra.gmra.mxu0 %vm723_vm5, %v858_v61  ;;  %1210 = vmatmul.msk.f32.vlgmr.msra.gmra.mxu2 %vm723_vm5, %v929_v60 }
 0x353   : > { %1023 = vmatpush.msrb.mxu0 %v1003_v51 }
 0x354   : > { %v747_v62 = vpop.f32.mrf.mxu0 }
 0x355   : > { %v750_v63 = vsel %vm723_vm5, %v747_v62, -inf  ;;  %1024 = vmatpush.msrb.mxu0 %v1002_v52 }
 0x356   : > { %v700_v1 = vpop.permute.xlu1 %699  ;;  %751 = vmax.xlane.f32.xlu1 %v750_v63 }
 0x357   : > { %1199 = vmatmul.msk.f32.vlgmr.msra.gmra.mxu3 %vm556_vm0, %v700_v1  ;;  %1025 = vmatpush.msrb.mxu0 %v1001_v53 }
 0x359   : > { %1026 = vmatpush.msrb.mxu0 %v1000_v54 }
 0x3c9   : > { %v752_v2 = vpop.xlane.xlu1 %751 }
 0x3ca   : > { %v753_v3 = vsub.f32 %v747_v62, %v752_v2 }
 0x3cc   : > { %v754_v4 = vmul.f32 1.442695, %v753_v3 }
 0x3cd   : > { %v810_v5 = vpop.f32.mrf.mxu2 }
 0x3ce   : > { %1346 = vpow2.f32 %v754_v4  ;;  %v813_v6 = vsel %vm723_vm5, %v810_v5, -inf }
 0x3cf   : > { %814 = vmax.xlane.f32.xlu2 %v813_v6  ;;  %v882_v7 = vpop.f32.mrf.mxu0 }
 0x3d0   : > { %v885_v12 = vsel %vm723_vm5, %v882_v7, -inf }
 0x3d4   : > { %v1347_v8 = vpop.eup %1346 }
 0x3d5   : > { %v953_v9 = vpop.f32.mrf.mxu2  ;;  %v756_v10 = vsel %vm723_vm5, %v1347_v8, 0.0 }
 0x3d6   : > { %757 = vadd.xlane.f32.xlu1 %v756_v10  ;;  %v956_v11 = vsel %vm723_vm5, %v953_v9, -inf }
 0x3d7   : > { %957 = vmax.xlane.f32.xlu0 %v956_v11  ;;  %886 = vmax.xlane.f32.xlu2 %v885_v12 }
 0x3da   : > { %v720_v14 = vpop.f32.mrf.mxu3 }
 0x3db   : > { %v721_v15 = vadd.f32 %v1340_v13, %v720_v14 }
 0x3dd   : > { %779 = vmatpush.msrb.mxu1 %v721_v15 }
 0x442   : > { %v815_v16 = vpop.xlane.xlu2 %814 }
 0x443   : > { %v816_v17 = vsub.f32 %v810_v5, %v815_v16 }
 0x445   : > { %v817_v18 = vmul.f32 1.442695, %v816_v17 }
 0x447   : > { %1348 = vpow2.f32 %v817_v18 }
 0x449   : > { %v758_v19 = vpop.xlane.xlu1 %757 }
 0x44a   : > { %1350 = vrcp.f32 %v758_v19  ;;  %v958_v20 = vpop.xlane.xlu0 %957  ;;  %v887_v21 = vpop.xlane.xlu2 %886 }
 0x44b   : > { %v959_v22 = vsub.f32 %v953_v9, %v958_v20  ;;  %v888_v23 = vsub.f32 %v882_v7, %v887_v21 }
 0x44d   : > { %v1349_v24 = vpop.eup %1348  ;;  %v960_v25 = vmul.f32 1.442695, %v959_v22  ;;  %v889_v26 = vmul.f32 1.442695, %v888_v23 }
 0x44e   : > { %v819_v27 = vsel %vm723_vm5, %v1349_v24, 0.0 }
 0x44f   : > { %1352 = vpow2.f32 %v960_v25  ;;  %820 = vadd.xlane.f32.xlu2 %v819_v27 }
 0x450   : > { %v1351_v28 = vpop.eup %1350  ;;  %1354 = vpow2.f32 %v889_v26 }
 0x451   : > { %v760_v29 = vmul.f32 %v1351_v28, %v1347_v8 }
 0x453   : > { %1202 = vmatmul.msk.f32.vlgmr.msrb.gmra.mxu1 %vm723_vm5, %v760_v29 }
 0x455   : > { %v1353_v30 = vpop.eup %1352 }
 0x456   : > { %v1355_v31 = vpop.eup %1354  ;;  %v962_v32 = vsel %vm723_vm5, %v1353_v30, 0.0 }
 0x457   : > { %963 = vadd.xlane.f32.xlu0 %v962_v32  ;;  %v891_v33 = vsel %vm723_vm5, %v1355_v31, 0.0 }
 0x458   : > { %892 = vadd.xlane.f32.xlu1 %v891_v33 }
 0x467   : > { %825 = vrot.lane.b32.xlu2 %v721_v15, %s1663_s10  ;;  %s2021_s10 = sld [smem:[#allocation27_spill]] }
 0x46b   : > { %967 = vrot.lane.b32.xlu0 %v721_v15, %s1662_s5 }
 0x46d   : > { %v1341_v58 = vld [vmem:[%s2021_s10] ss:$0 sm:$0xff] }
 0x471   : > { %896 = vrot.lane.b32.xlu1 %v721_v15, %s1664_s21  ;;  %s2022_s21 = sld [smem:[#allocation28_spill]] }
 0x477   : > { %s1044_s13 = scalar_lea.hbm %s2022_s21, %s1214_s23  ;;  %s1592_s30 = scalar_lea.hbm %s2022_s21, 16 }
 0x478   : > { %s1048_s9 = sshll.u32 %s1044_s13, 4  ;;  %s1049_s9 = int_to_ptr.hbm [resolvable:$true] %s1048_s9 }
 0x4c2   : > { %v821_v34 = vpop.xlane.xlu2 %820 }
 0x4c3   : > { %1356 = vrcp.f32 %v821_v34 }
 0x4c9   : > { %v1357_v35 = vpop.eup %1356 }
 0x4ca   : > { %v826_v36 = vpop.permute.xlu2 %825  ;;  %v823_v37 = vmul.f32 %v1357_v35, %v1349_v24  ;;  %v964_v39 = vpop.xlane.xlu0 %963 }
 0x4cb   : > { %846 = vmatpush.msrb.mxu3 %v826_v36  ;;  %1358 = vrcp.f32 %v964_v39  ;;  %v893_v40 = vpop.xlane.xlu1 %892 }
 0x4cc   : > { %1205 = vmatmul.msk.f32.vlgmr.msrb.gmra.mxu3 %vm723_vm5, %v823_v37  ;;  %1360 = vrcp.f32 %v893_v40 }
 0x4d0   : > { %v781_v38 = vpop.f32.mrf.mxu1 }
 0x4d1   : > { %784 = vst.msk [vmem:[#allocation2] sm:$0xff] %vm723_vm5, %v781_v38  ;;  %v1359_v41 = vpop.eup %1358 }
 0x4d2   : > { %v966_v42 = vmul.f32 %v1359_v41, %v1353_v30  ;;  %v1361_v44 = vpop.eup %1360 }
 0x4d3   : > { %v895_v45 = vmul.f32 %v1361_v44, %v1355_v31 }
 0x4dd   : > { %v968_v43 = vpop.permute.xlu0 %967 }
 0x4de   : > { %988 = vmatpush.msra.mxu3 %v968_v43 }
 0x4df   : > { %1211 = vmatmul.msk.f32.vlgmr.msra.gmra.mxu3 %vm723_vm5, %v966_v42 }
 0x4e3   : > { %v897_v46 = vpop.permute.xlu1 %896 }
 0x4e4   : > { %917 = vmatpush.msra.mxu1 %v897_v46 }
 0x4e5   : > { %1208 = vmatmul.msk.f32.vlgmr.msra.gmra.mxu1 %vm723_vm5, %v895_v45 }
 0x54f   : > { %v848_v47 = vpop.f32.mrf.mxu3 }
 0x550   : > { %852 = vrot.lane.b32.xlu2 %v848_v47, %s1666_s16  ;;  %s1586_s16 = sshra.s32 %s1049_s9, 4  ;;  %s1587_s16 = int_to_ptr.hbm [resolvable:$true] %s1586_s16 }
 0x551   : > { %p1593_p12 = scmp.lt.s32.totalorder %s1587_s16, %s2022_s21 }
 0x562   : > { %v919_v48 = vpop.f32.mrf.mxu1  ;;  %v990_v49 = vpop.f32.mrf.mxu3 }
 0x563   : > { %923 = vrot.lane.b32.xlu0 %v919_v48, %s1667_s22  ;;  %994 = vrot.lane.b32.xlu2 %v990_v49, %s1668_s18  ;;  %s1588_s22 = scalar_lea.hbm %s1587_s16, 8 }
 0x564   : > { %p1589_p1 = scmp.ne.s32.totalorder %s1587_s16, %s1588_s22  ;;  %p1594_p7 = scmp.lt.s32.totalorder %s1592_s30, %s1588_s22 }
 0x566   : > { %p1590_p3 = pnand %p1589_p1, %p1836_p5  ;;  %p1595_p8 = por %p1594_p7, %p1593_p12 }
 0x568   : > { %p1591_p4 = pneg %p1590_p3 }
 0x56a   : > { %p1596_p9 = pnand %p1595_p8, %p1591_p4 }
 0x5aa   : > { %v853_v50 = vpop.permute.xlu2 %852 }
 0x5ab   : > { %856 = vst.msk [vmem:[#allocation2] sm:$0xff] %vm855_vm6, %v853_v50 }
 0x5bd   : > { %v995_v56 = vpop.permute.xlu2 %994 }
 0x5d5   : > { %v924_v55 = vpop.permute.xlu0 %923 }
 0x5d6   : > { %927 = vst.msk [vmem:[#allocation2] sm:$0xff] %vm926_vm7, %v924_v55 }
 0x5d7   : > { %998 = vst.msk [vmem:[#allocation2] sm:$0xff] %vm997_vm8, %v995_v56 }
 0x5de   : > { %v999_v57 = vld [vmem:[#allocation2] sm:$0xff] }
 0x5df   : > { %1212 = vmatmul.msk.f32.vlgmr.msrb.gmra.mxu0 %vm556_vm0, %v999_v57 }
 0x65c   : > { %v1028_v59 = vpop.f32.mrf.mxu0 }
 0x65d   : > { %v1029_v60 = vadd.f32 %v1341_v58, %v1028_v59 }
 0x65f   : > { %v1031_v61 = vadd.f32 %v1029_v60, %v1889_v0 }
 0x661   : > { %1032 = vst.msk [vmem:[%s554_s7] sm:$0xff] %vm556_vm0, %v1031_v61 }
 0x662   : > { %1599 = shalt.err (!%p1596_p9)
}
 0x663   : > { %1243 = dma.vmem_to_hbm [thread:$0]  (%p1836_p5), %s1047_s3, 128, %s1049_s9, %s1034_s15  }
 0x664 PF: > { %s1060_s19 = sand.u32 1, %s1638_s25   ;;  %p2023_p10 = scmp.ge.s32.totalorder %s1650_s28, 2 }
 0x665   : > { %s1061_s10 = scalar_lea.sflag [#allocation5], %s1060_s19 }
 0x666   : > { %p1269_p13 = pnand %p2023_p10, %p1840_p6 }
 0x668   : > { %p1270_p11 = pneg %p1269_p13 }
 0x66a   : > { %1633 = dma.done.wait (%p1270_p11), %s1061_s10, 128  }
 0x66b   : > { %1635 = vsyncadd (%p1270_p11), %s1061_s10, 4294967168  ;;  %p29_p0 = scmp.ge.s32.totalorder %s1810_s14, 4   ;;  %s2024_s25 = smov %s1642_s26 }
 0x66c   : > { %s2025_s26 = smov %s1646_s27  ;;  %s2026_s27 = smov %s1821_s24 }
 0x66d   : > { %s2027_s28 = smov %s1810_s14  ;;  %31 = sbr.rel (!%p29_p0) target bundleno = 17 (0x11), region = 141 }
 0x672   :  { %1067 = vsyncpa [#allocation4], 1 }
 0x673   :  { %1069 = vsyncpa [#allocation4 + $0x1], 1 }
 0x674   :  { %1070 = vsyncpa [#allocation7], 1 }
 0x675   :  { %1071 = vsyncpa [#allocation10], 1 }
 0x676   :  { %1072 = vsyncpa [#allocation13], 1 }
 0x677   :  { %1073 = vsyncpa [#allocation5], 1 }
 0x678   :  { %1075 = vsyncpa [#allocation5 + $0x1], 1 }

</bundles_post_ra>
